<compile_context>
chip_gen: v7x
topology: tpu7x:2x2x1
jax: 0.10.0
libtpu: 0.0.40
codegen_flags: <defaults>
</compile_context>

<pallas_src>
import functools

import jax
import jax.numpy as jnp
import numpy as np
from jax.experimental import pallas as pl
from jax.experimental.pallas import tpu as pltpu


def _round_up(x, m):
    return ((x + m - 1) // m) * m


def _ht_vote_kernel(code_ref, wgt_ref, out_ref, *, rows, cols):
    """Vote accumulation for one (batch, l-tile) block.

    code_ref : (TL, V) int32  packed bin  code = row * 65536 + col
               (row == `rows` encodes an out-of-range / masked vote)
    wgt_ref  : (TL, V) f32    per-vote weight (channels pre-reduced in wrapper)
    out_ref  : (TL, rows, cols) out-dtype, lane-dense histogram (cols % 128 == 0)
    """
    code = code_ref[...]
    wgt = wgt_ref[...]
    row = code >> 16                        # (TL, V) in [0, rows]  (rows -> masked)
    col = code & 0xFFFF                     # (TL, V) in [0, cols)

    # Tiny (1, 1, N) iotas; '==' broadcasts them against row/col (no full-size
    # TL*V*(rows+cols) int32 temporaries).
    iota_r = jax.lax.broadcasted_iota(jnp.int32, (1, 1, rows), 2)
    iota_c = jax.lax.broadcasted_iota(jnp.int32, (1, 1, cols), 2)

    # Separable one-hots with the weight folded into the row side.  Masked votes
    # (row == rows) match no row bin, so no explicit where-masking is required.
    oh_r = jnp.where(iota_r == row[:, :, None], wgt[:, :, None], 0.0)   # (TL, V, rows)
    oh_c = (iota_c == col[:, :, None]).astype(jnp.float32)              # (TL, V, cols)
    # TODO(synk): for MXU-bound shapes (large rows*cols) bf16 one-hots would ~3x the
    #             matmul throughput at the cost of ~8 mantissa bits of weight precision;
    #             for very small V a pure-VPU accumulate may beat the K-starved matmul.

    # Batched (rows x V) @ (V x cols) per src voxel -> MXU, f32 accumulation.
    acc = jnp.einsum("tvr,tvc->trc", oh_r, oh_c, preferred_element_type=jnp.float32)
    out_ref[...] = acc.astype(out_ref.dtype)        # final-dtype cast inside the kernel


class HTCudaPallas:
    """JAX/Pallas re-implementation of HT_CUDA.forward."""

    _FLAT_HW_MAX = 1024      # use the flat-bin layout when padded h*w is this small

    def __init__(self, h, w, d):
        assert h % 2 == 0 and w % 2 == 0
        self.h, self.w, self.d = h, w, d

    def __call__(self, feats_src_dst, voxels_src, voxels_dst, idxs_src, idxs_dst):
        assert feats_src_dst.ndim == 4
        assert voxels_src.shape == voxels_dst.shape
        b, l, n, c = feats_src_dst.shape
        m = idxs_src.shape[-1]
        h, w, d = self.h, self.w, self.d
        out_dtype = feats_src_dst.dtype

        idxs_src_i = idxs_src.astype(jnp.int32)
        idxs_dst_i = idxs_dst.astype(jnp.int32)

        # ---- channel pre-reduction BEFORE the gathers ------------------------
        wgt_tbl = jnp.sum(feats_src_dst.astype(jnp.float32), axis=-1)     # [b, l, n]

        # ---- two-level KNN gathers (plain JAX/XLA glue) ----------------------
        # TODO(synk): for large l*m*n move these gathers into the kernel via
        #             PrefetchScalarGridSpec (indices in SMEM) + manual DMA to avoid
        #             the m-fold HBM duplication of the gathered intermediates.
        gather = jax.vmap(lambda tbl, idx: tbl[idx])
        vox_src_j = gather(voxels_src.astype(jnp.float32), idxs_src_i)    # [b, l, m, 2]
        idxs_dst_j = gather(idxs_dst_i, idxs_src_i)                       # [b, l, m, n]
        vox_dst_k = gather(voxels_dst.astype(jnp.float32), idxs_dst_j)    # [b, l, m, n, 2]
        wgt_j = gather(wgt_tbl, idxs_src_i)                               # [b, l, m, n]

        v = m * n
        trans = vox_dst_k - vox_src_j[:, :, :, None, :]                   # [b, l, m, n, 2]
        dy = trans[..., 0]
        dx = trans[..., 1]

        # ---- binning in the wrapper (gather epilogue) -------------------------
        by = jnp.floor(dy / jnp.float32(d) + 0.5).astype(jnp.int32) + (h // 2)
        bx = jnp.floor(dx / jnp.float32(d) + 0.5).astype(jnp.int32) + (w // 2)
        valid = (by >= 0) & (by < h) & (bx >= 0) & (bx < w)

        # ---- lane-dense output layout -----------------------------------------
        w_pad = _round_up(w, 128)
        hw_pad = _round_up(h * w, 128)
        use_flat = (hw_pad <= self._FLAT_HW_MAX) and (hw_pad < h * w_pad)
        if use_flat:
            rows, cols = hw_pad // 128, 128          # flat bin q = by*w + bx, split /128
            q = by * w + bx
            row, col = q // cols, q % cols
        else:
            rows, cols = h, w_pad                    # natural (h, w_pad) layout
            row, col = by, bx
        assert rows <= 32767 and cols <= 65536       # packed int32 bin-code range
        row = jnp.where(valid, row, rows)            # rows == "matches nothing" sentinel
        col = jnp.where(valid, col, 0)
        code = (row * 65536 + col).astype(jnp.int32).reshape(b, l, v)     # [b, l, V]
        wgt_v = wgt_j.reshape(b, l, v).astype(jnp.float32)                # [b, l, V]

        # ---- VMEM-budgeted l-tile and compiler VMEM limit ----------------------
        out_bytes = jnp.dtype(out_dtype).itemsize
        try:
            vmem_cap = pltpu.get_tpu_info().vmem_capacity_bytes
        except Exception:
            vmem_cap = 64 * 1024 * 1024              # v7x physical VMEM (most restrictive)
        vmem_limit = min((vmem_cap * 3) // 4, 112 * 1024 * 1024)
        tl = self._pick_l_tile(b, l, v, rows, cols, out_bytes, vmem_limit // 2)
        grid = (b, l // tl)

        kernel = functools.partial(_ht_vote_kernel, rows=rows, cols=cols)
        out = pl.pallas_call(
            kernel,
            out_shape=jax.ShapeDtypeStruct((b, l, rows, cols), out_dtype),
            grid=grid,
            in_specs=[
                pl.BlockSpec((None, tl, v), lambda bi, li: (bi, li, 0)),
                pl.BlockSpec((None, tl, v), lambda bi, li: (bi, li, 0)),
            ],
            out_specs=pl.BlockSpec((None, tl, rows, cols),
                                   lambda bi, li: (bi, li, 0, 0)),
            compiler_params=pltpu.CompilerParams(
                dimension_semantics=("parallel", "parallel"),
                vmem_limit_bytes=int(vmem_limit),
            ),
        )(code, wgt_v)

        if use_flat:
            vol = out.reshape(b, l, rows * cols)[..., : h * w].reshape(b, l, h, w)
        else:
            vol = out[..., :w]
        return vol

    @staticmethod
    def _pick_l_tile(b, l, v, rows, cols, out_bytes, budget):
        """Largest l-tile whose estimated VMEM footprint fits `budget`, preferring
        tiles that keep >= ~8 grid steps (pipelining + v7x megacore sharding)."""
        cands = sorted({l, *[t for t in range(8, l, 8) if l % t == 0]}, reverse=True)

        def footprint(tl):
            io_in = 2 * 2 * tl * v * 4                      # code + wgt, double-buffered
            io_out = 2 * tl * rows * cols * out_bytes       # output, double-buffered
            tmp = tl * (8 * v * (rows + cols)               # one-hot masks + values
                        + 8 * v                             # unpacked row/col int32
                        + 4 * rows * cols)                  # f32 matmul accumulator
            return io_in + io_out + tmp

        fitting = [t for t in cands if footprint(t) <= budget]
        if not fitting:
            return cands[-1]                                # smallest legal tile
        target = min(8, b * (l // fitting[-1]))
        good = [t for t in fitting if b * (l // t) >= target]
        return good[0] if good else fitting[0]


def _reference_forward(feats, vsrc, vdst, isrc, idst, h, w, d):
    """Pure-numpy reference of the same voting semantics (for verification)."""
    feats = np.asarray(feats, np.float32)
    vsrc = np.asarray(vsrc, np.float32)
    vdst = np.asarray(vdst, np.float32)
    isrc = np.asarray(isrc, np.int64)
    idst = np.asarray(idst, np.int64)
    b, l, n, c = feats.shape
    m = isrc.shape[-1]
    out = np.zeros((b, l, h, w), np.float32)
    for bi in range(b):
        for i in range(l):
            for mi in range(m):
                j = int(isrc[bi, i, mi])
                for ni in range(n):
                    k = int(idst[bi, j, ni])
                    dy = vdst[bi, k, 0] - vsrc[bi, j, 0]
                    dx = vdst[bi, k, 1] - vsrc[bi, j, 1]
                    by = int(np.floor(dy / d + 0.5)) + h // 2
                    bx = int(np.floor(dx / d + 0.5)) + w // 2
                    if 0 <= by < h and 0 <= bx < w:
                        out[bi, i, by, bx] += feats[bi, j, ni, :].sum()
    return out


def _run_case(key, b, l, m, n, c, h, w, d):
    k1, k2, k3, k4, k5 = jax.random.split(key, 5)
    feats = jax.random.normal(k1, (b, l, n, c), jnp.float32)
    vsrc = jax.random.randint(k2, (b, l, 2), 0, 6).astype(jnp.float32)
    vdst = jax.random.randint(k3, (b, l, 2), 0, 6).astype(jnp.float32)
    isrc = jax.random.randint(k4, (b, l, m), 0, l)
    idst = jax.random.randint(k5, (b, l, n), 0, l)

    ht = HTCudaPallas(h, w, d)
    vol = jax.block_until_ready(ht(feats, vsrc, vdst, isrc, idst))
    ref = _reference_forward(feats, vsrc, vdst, isrc, idst, h, w, d)
    np.testing.assert_allclose(np.asarray(vol), ref, rtol=1e-4, atol=1e-4)


if __name__ == "__main__":
    key = jax.random.PRNGKey(0)
    k_a, k_b = jax.random.split(key)
    # flat-bin path: 8x8 histogram -> one lane-dense 128-wide bin row per voxel.
    _run_case(k_a, b=2, l=8, m=4, n=4, c=6, h=8, w=8, d=1)
    # separable path: width already lane-aligned (w = 128).
    _run_case(k_b, b=2, l=8, m=4, n=4, c=6, h=8, w=128, d=1)
    print("KERNEL_OK")
</pallas_src>

<mosaic_0001>
module attributes {stable_mosaic.version = 11 : i64} {
  func.func @_ht_vote_kernel(%arg0: i32, %arg1: i32, %arg2: memref<1x8x16xi32, #tpu.memory_space<vmem>>, %arg3: memref<1x8x16xf32, #tpu.memory_space<vmem>>, %arg4: memref<1x8x1x128xf32, #tpu.memory_space<vmem>>) attributes {dimension_semantics = [#tpu.dimension_semantics<parallel>, #tpu.dimension_semantics<parallel>], iteration_bounds = array<i64: 2, 1>, scalar_prefetch = 0 : i64, scratch_operands = 0 : i64, tpu.core_type = #tpu.core_type<tc>, window_params = [{transform_indices = @transform_0, window_bounds = array<i64: 1, 8, 16>}, {transform_indices = @transform_1, window_bounds = array<i64: 1, 8, 16>}, {transform_indices = @transform_2, window_bounds = array<i64: 1, 8, 1, 128>}]} {
    %c0 = arith.constant 0 : index
    %c0_0 = arith.constant 0 : index
    %c0_1 = arith.constant 0 : index
    %0 = vector.load %arg2[%c0, %c0_0, %c0_1] : memref<1x8x16xi32, #tpu.memory_space<vmem>>, vector<1x8x16xi32>
    %1 = vector.shape_cast %0 : vector<1x8x16xi32> to vector<8x16xi32>
    %c0_2 = arith.constant 0 : index
    %c0_3 = arith.constant 0 : index
    %c0_4 = arith.constant 0 : index
    %2 = vector.load %arg3[%c0_2, %c0_3, %c0_4] : memref<1x8x16xf32, #tpu.memory_space<vmem>>, vector<1x8x16xf32>
    %3 = vector.shape_cast %2 : vector<1x8x16xf32> to vector<8x16xf32>
    %c16_i32 = arith.constant 16 : i32
    %4 = vector.broadcast %c16_i32 : i32 to vector<8x16xi32>
    %5 = arith.shrsi %1, %4 : vector<8x16xi32>
    %c65535_i32 = arith.constant 65535 : i32
    %6 = vector.broadcast %c65535_i32 : i32 to vector<8x16xi32>
    %7 = arith.andi %1, %6 : vector<8x16xi32>
    %8 = tpu.iota {dimensions = array<i32: 2>} : vector<1x1x1xi32>
    %9 = tpu.iota {dimensions = array<i32: 2>} : vector<1x1x128xi32>
    %10 = vector.shape_cast %5 : vector<8x16xi32> to vector<8x16x1xi32>
    %11 = vector.broadcast %8 : vector<1x1x1xi32> to vector<8x16x1xi32>
    %12 = arith.cmpi eq, %11, %10 : vector<8x16x1xi32>
    %13 = vector.shape_cast %3 : vector<8x16xf32> to vector<8x16x1xf32>
    %cst = arith.constant 0.000000e+00 : f32
    %14 = vector.broadcast %cst : f32 to vector<8x16x1xf32>
    %15 = arith.select %12, %13, %14 : vector<8x16x1xi1>, vector<8x16x1xf32>
    %16 = vector.shape_cast %7 : vector<8x16xi32> to vector<8x16x1xi32>
    %17 = vector.broadcast %9 : vector<1x1x128xi32> to vector<8x16x128xi32>
    %18 = vector.broadcast %16 : vector<8x16x1xi32> to vector<8x16x128xi32>
    %19 = arith.cmpi eq, %17, %18 : vector<8x16x128xi32>
    %20 = arith.extui %19 : vector<8x16x128xi1> to vector<8x16x128xi32>
    %21 = arith.sitofp %20 : vector<8x16x128xi32> to vector<8x16x128xf32>
    "tpu.trace_start"() <{level = 10 : i32, message = "tvr,tvc->trc"}> : () -> ()
    %cst_5 = arith.constant dense<0.000000e+00> : vector<8x1x128xf32>
    %22 = tpu.matmul %15, %21, %cst_5 {dimension_numbers = #tpu.dot_dimension_numbers<[1], [1], [2], [2], [0, 0, 0, 2, 1, 2], [0], [0]>} : vector<8x16x1xf32>, vector<8x16x128xf32>, vector<8x1x128xf32> -> vector<8x1x128xf32>
    "tpu.trace_stop"() : () -> ()
    %c0_6 = arith.constant 0 : index
    %c0_7 = arith.constant 0 : index
    %c0_8 = arith.constant 0 : index
    %c0_9 = arith.constant 0 : index
    %23 = vector.load %arg4[%c0_6, %c0_7, %c0_8, %c0_9] : memref<1x8x1x128xf32, #tpu.memory_space<vmem>>, vector<1x8x1x128xf32>
    %24 = vector.shape_cast %23 : vector<1x8x1x128xf32> to vector<8x1x128xf32>
    %25 = vector.shape_cast %22 : vector<8x1x128xf32> to vector<1x8x1x128xf32>
    tpu.vector_store %arg4[%c0_6, %c0_7, %c0_8, %c0_9], %25 {strides = array<i32>} : memref<1x8x1x128xf32, #tpu.memory_space<vmem>>, vector<1x8x1x128xf32>,
    return
  }
  func.func @transform_0(%arg0: i32, %arg1: i32) -> (i32, i32, i32) {
    %c0_i32 = arith.constant 0 : i32
    %c0_i32_0 = arith.constant 0 : i32
    return %arg0, %arg1, %c0_i32 : i32, i32, i32
  }
  func.func @transform_1(%arg0: i32, %arg1: i32) -> (i32, i32, i32) {
    %c0_i32 = arith.constant 0 : i32
    %c0_i32_0 = arith.constant 0 : i32
    return %arg0, %arg1, %c0_i32 : i32, i32, i32
  }
  func.func @transform_2(%arg0: i32, %arg1: i32) -> (i32, i32, i32, i32) {
    %c0_i32 = arith.constant 0 : i32
    %c0_i32_0 = arith.constant 0 : i32
    %c0_i32_1 = arith.constant 0 : i32
    return %arg0, %arg1, %c0_i32, %c0_i32_0 : i32, i32, i32, i32
  }
}

</mosaic_0001>

<bundles_post_ra>
// kernel: tpu_custom_call.1
= control target key start
LH: loop header
LB: loop body
LE: loop exit
PB: predicated region body
PF: predicated region fallthrough
CT: control target
= control target key end

     0   :  { %7 = vsyncpa [#allocation3], 0  ;;  %s2261_s0 = inlined_call_operand.hbm [shape: s32[2,8,16], index: 0, kind: input, shape index: {}]   ;;  %s2262_s1 = inlined_call_operand.hbm [shape: f32[2,8,16], index: 1, kind: input, shape index: {}]   ;;  %s2263_s2 = inlined_call_operand.hbm [shape: f32[2,8,1,128], index: 2, kind: output, shape index: {}]  }
   0x1   :  { %9 = vsyncpa [#allocation3 + $0x1], 0 }
   0x2   :  { %10 = vsyncpa [#allocation6], 0 }
   0x3   :  { %12 = vsyncpa [#allocation6 + $0x1], 0 }
   0x4   :  { %13 = vsyncpa [#allocation4], 0 }
   0x5   :  { %15 = vsyncpa [#allocation4 + $0x1], 0  ;;  %s1948_s9 = smov 0   ;;  %s1950_s10 = smov 0  }
   0x6   :  { %s1952_s11 = smov 0   ;;  %s1954_s12 = smov 0  }
   0x7   :  { %s1956_s13 = smov 0   ;;  %s1958_s14 = smov 0  }
   0x8 LB: > { %s1541_s15 = sadd.s32 4294967295, %s1922_s14   ;;  %s1542_s16 = sadd.s32 4294967294, %s1922_s14   ;;  %s1922_s14 = sphi %s1958_s14, %s21_s14   ;;  %s1918_s13 = sphi %s1956_s13, %s2283_s13   ;;  %s1914_s12 = sphi %s1954_s12, %s2282_s12   ;;  %s1910_s11 = sphi %s1952_s11, %s2281_s11   ;;  %s1906_s10 = sphi %s1950_s10, %s2280_s10   ;;  %s1902_s9 = sphi %s1948_s9, %s2279_s9  }
   0x9   : > { %s33_s17 = sadd.s32 1, %s1918_s13  ;;  %s42_s18 = sadd.s32 1, %s1910_s11 }
   0xa   : > { %p35_p0 = scmp.ge.s32.totalorder %s33_s17, 2  ;;  %p49_p1 = scmp.ne.s32.totalorder %s1910_s11, %s1906_s10 }
   0xb   : > { %p50_p2 = scmp.eq.s32.totalorder %s1922_s14, 0  ;;  %p55_p3 = scmp.ne.s32.totalorder %s1906_s10, %s1902_s9 }
   0xc   : > { %s2285_s17 = smov (%p35_p0, %s33_s17), 0  ;;  %p56_p5 = scmp.eq.s32.totalorder %s1541_s15, 0 }
   0xd   : > { %p1989_p4 = por %p50_p2, %p49_p1  ;;  %s37_s20 = ssub.s32 %s1918_s13, %s2285_s17 }
   0xe   : > { %p109_p6 = scmp.eq.s32.totalorder %s1541_s15, 1  ;;  %p40_p7 = scmp.eq.s32.totalorder %s37_s20, 0 }
   0xf   : > { %p1995_p8 = por %p56_p5, %p55_p3  ;;  %p115_p10 = scmp.eq.s32.totalorder %s1542_s16, 1 }
  0x10   : > { %p1999_p9 = por %p109_p6, %p49_p1  ;;  %p1720_p13 = scmp.lt.s32.totalorder %s1922_s14, 2 }
  0x11   : > { %s2267_s21 = scalar_select %p1995_p8, 1, 0 }
  0x12   : > { %s2268_s22 = scalar_select %p1999_p9, 1, 0 }
  0x13   : > { %s2004_s23 = scalar_select %p40_p7, %s1910_s11, %s42_s18  }
  0x14   : > { %p2006_p11 = por %p115_p10, %p55_p3  ;;  %s2013_s25 = sand.u32 1, %s1910_s11  }
  0x15   : > { %s1545_s26 = sshll.u32 %s2013_s25, 3  ;;  %s1546_s27 = sshll.u32 %s1918_s13, 7 }
  0x16   : > { %s2269_s24 = scalar_select %p2006_p11, 1, 0 }
  0x17   : > { %s2022_s30 = scalar_lea.hbm %s2261_s0, %s1546_s27  ;;  %s139_s3 = scalar_lea.vmem [#allocation2], %s1545_s26 }
  0x18   : > { %s147_s4 = sshll.u32 %s139_s3, 4  ;;  %p2030_p0 = pnand %p1720_p13, %p1989_p4  ;;  %s2026_s4 = int_to_ptr.vmem [resolvable:$true] %s147_s4 }
  0x19   : > { %s136_s6 = scalar_lea.sflag [#allocation3], %s2013_s25  ;;  %s1776_s7 = scalar_lea.hbm %s2022_s30, 128 }
  0x1a   : > { %p1777_p3 = scmp.ne.s32.totalorder %s2022_s30, %s1776_s7  ;;  %p1778_p5 = pneg %p2030_p0 }
  0x1b   : > { %s1781_s16 = scalar_lea.hbm %s2261_s0, 256  ;;  %p1782_p4 = scmp.lt.u32.totalorder %s2022_s30, %s2261_s0 }
  0x1c   : > { %p1779_p6 = pnand %p1778_p5, %p1777_p3  ;;  %p1783_p10 = scmp.lt.u32.totalorder %s1781_s16, %s1776_s7 }
  0x1d   : > { %p1785_p12 = scmp.lt.u32.totalorder %s1776_s7, %s2022_s30 }
  0x1e   : > { %p1780_p7 = pneg %p1779_p6  ;;  %p1784_p13 = por %p1783_p10, %p1782_p4 }
  0x20   : > { %p1786_p1 = por %p1785_p12, %p1784_p13 }
  0x22   : > { %p1787_p2 = pnand %p1786_p1, %p1780_p7 }
  0x24   : > { %1790 = shalt.err (!%p1787_p2)
}
  0x25   : > { %s1791_s20 = scalar_lea.vmem %s2026_s4, 128  ;;  %s1924_s28 = smov [#allocation2]  }
  0x26   : > { %p1792_p3 = scmp.ne.s32.totalorder %s2026_s4, %s1791_s20  ;;  %s1796_s29 = sshll.u32 %s1924_s28, 4  ;;  %s1797_s29 = int_to_ptr.vmem [resolvable:$false] %s1796_s29 }
  0x27   : > { %s1798_s3 = scalar_lea.vmem %s1797_s29, 256  ;;  %p1799_p9 = scmp.lt.s32.totalorder %s2026_s4, %s1797_s29 }
  0x28   : > { %p1794_p6 = pnand %p1792_p3, %p1778_p5  ;;  %p1800_p4 = scmp.lt.s32.totalorder %s1798_s3, %s1791_s20 }
  0x2a   : > { %p1795_p11 = pneg %p1794_p6  ;;  %p1801_p10 = por %p1800_p4, %p1799_p9 }
  0x2c   : > { %p1802_p12 = pnand %p1801_p10, %p1795_p11 }
  0x2e   : > { %1805 = shalt.err (!%p1802_p12)
}
  0x2f   : > { %1712 = dma.hbm_to_vmem [thread:$0]  (!%p2030_p0), %s2022_s30, 128, %s2026_s4, %s136_s6  }
  0x30   : > { %p2271_p1 = scmp.lt.s32.totalorder %s1922_s14, 3  ;;  %p2272_p2 = scmp.ge.s32.totalorder %s1922_s14, 1 }
  0x31   : > { %s2075_s16 = scalar_lea.hbm %s2262_s1, %s1546_s27  ;;  %s158_s18 = scalar_lea.vmem [#allocation5], %s1545_s26 }
  0x32   : > { %p2066_p7 = pnand %p2272_p2, %p2271_p1  ;;  %s166_s19 = sshll.u32 %s158_s18, 4  ;;  %s167_s19 = int_to_ptr.vmem [resolvable:$true] %s166_s19 }
  0x33   : > { %s155_s30 = scalar_lea.sflag [#allocation6], %s2013_s25  ;;  %s1806_s4 = scalar_lea.hbm %s2075_s16, 128 }
  0x34   : > { %s2273_s7 = scalar_select %p2066_p7, 1, 0 }
  0x35   : > { %p1807_p9 = scmp.ne.s32.totalorder %s2075_s16, %s1806_s4  ;;  %s1811_s27 = scalar_lea.hbm %s2262_s1, 256 }
  0x36   : > { %p1812_p3 = scmp.lt.u32.totalorder %s2075_s16, %s2262_s1  ;;  %p1813_p6 = scmp.lt.u32.totalorder %s1811_s27, %s1806_s4 }
  0x37   : > { %p1809_p11 = pnand %p1807_p9, %p1778_p5  ;;  %p1815_p10 = scmp.lt.u32.totalorder %s1806_s4, %s2075_s16 }
  0x38   : > { %p1814_p4 = por %p1813_p6, %p1812_p3 }
  0x39   : > { %p1810_p13 = pneg %p1809_p11 }
  0x3a   : > { %p1816_p12 = por %p1815_p10, %p1814_p4 }
  0x3c   : > { %p1817_p1 = pnand %p1816_p12, %p1810_p13 }
  0x3e   : > { %1820 = shalt.err (!%p1817_p1)
}
  0x3f   : > { %s1821_s25 = scalar_lea.vmem %s167_s19, 128  ;;  %s1925_s26 = smov [#allocation5]  }
  0x40   : > { %p1822_p2 = scmp.ne.s32.totalorder %s167_s19, %s1821_s25  ;;  %s1826_s3 = sshll.u32 %s1925_s26, 4  ;;  %s1827_s3 = int_to_ptr.vmem [resolvable:$false] %s1826_s3 }
  0x41   : > { %s1828_s8 = scalar_lea.vmem %s1827_s3, 256  ;;  %p1829_p8 = scmp.lt.s32.totalorder %s167_s19, %s1827_s3 }
  0x42   : > { %p1824_p9 = pnand %p1822_p2, %p1778_p5  ;;  %p1830_p7 = scmp.lt.s32.totalorder %s1828_s8, %s1821_s25 }
  0x44   : > { %p1825_p11 = pneg %p1824_p9  ;;  %p1831_p3 = por %p1830_p7, %p1829_p8 }
  0x46   : > { %p1832_p6 = pnand %p1831_p3, %p1825_p11 }
  0x48   : > { %1835 = shalt.err (!%p1832_p6)
}
  0x49   : > { %1715 = dma.hbm_to_vmem [thread:$0]  (!%p2030_p0), %s2075_s16, 128, %s167_s19, %s155_s30  }
  0x4a   : > { %p2274_p13 = scmp.ne.s32.totalorder %s2273_s7, 0 }
  0x4b   : > { %s2102_s15 = sand.u32 (!%p2274_p13), 1, %s1906_s10   ;;  %p2275_p8 = scmp.ne.s32.totalorder (!%p2274_p13), %s2267_s21, 0 }
  0x4c   : > { %175 = sbr.rel (%p2274_p13) target bundleno = 622 (0x26e), region = 28  ;;  %s2105_s18 = sshll.u32 (!%p2274_p13), %s2102_s15, 3 }
  0x4d   : > { %s178_s4 = scalar_lea.sflag (!%p2274_p13), [#allocation3], %s2102_s15  ;;  %s181_s6 = scalar_lea.vmem (!%p2274_p13), [#allocation2], %s2105_s18 }
  0x53   : > { %1889 = dma.done.wait (%p2275_p8), %s178_s4, 128  }
  0x54   : > { %1891 = vsyncadd (%p2275_p8), %s178_s4, 4294967168  ;;  %s187_s5 = scalar_lea.sflag [#allocation6], %s2102_s15  ;;  %s190_s7 = scalar_lea.vmem [#allocation5], %s2105_s18 }
  0x55   : > { %1893 = dma.done.wait (%p2275_p8), %s187_s5, 128  }
  0x56   : > { %1895 = vsyncadd (%p2275_p8), %s187_s5, 4294967168  ;;  %v221_v0 = vlaneseq  ;;  %v218_v4 = vld [vmem:[%s190_s7] sm:$0xff]  ;;  %v217_v5 = vld [vmem:[%s181_s6] sm:$0xff]  ;;  %v1926_v29 = vmov 0.0|0.0   ;;  %vm1927_vm0 = vmmov 0   ;;  %v1928_v37 = vmov 0.0  }
  0x57   : > { %v219_v7 = vshra.s32 %v217_v5, 16  ;;  %1679 = vmatprep.subr.bf16.mxu0 %v1926_v29  ;;  %1682 = vmatprep.subr.bf16.mxu1 %v1926_v29  ;;  %v220_v30 = vand.u32 65535, %v217_v5  ;;  %s215_s21 = scalar_lea.vmem [#allocation7], %s2105_s18  ;;  %s1598_s19 = sshll.u32 %s1914_s12, 7 }
  0x58   : > { %v224_v1 = vshrl.u32 %v221_v0, 7  ;;  %1627 = vmatprep.mubr.msk.f32.mxu0 %vm1927_vm0, %v1928_v37  ;;  %1634 = vmatprep.mubr.msk.f32.mxu1 %vm1927_vm0, %v1928_v37  ;;  %v2137_v42 = vand.u32 127, %v221_v0  ;;  %s1432_s16 = sshll.u32 %s215_s21, 4  ;;  %s2212_s27 = scalar_lea.hbm %s2263_s2, %s1598_s19  ;;  %s2207_s16 = int_to_ptr.vmem [resolvable:$true] %s1432_s16 }
  0x59   : > { %s1417_s28 = scalar_lea.sflag [#allocation4], %s2102_s15  ;;  %s1836_s29 = scalar_lea.vmem %s2207_s16, 128 }
  0x5a   : > { %v2120_v2 = vsub.s32 0, %v224_v1  ;;  %v2122_v3 = vsub.s32 1, %v224_v1  ;;  %v258_v11 = vsub.s32 3, %v224_v1  ;;  %v247_v12 = vsub.s32 2, %v224_v1  ;;  %p1837_p0 = scmp.ne.s32.totalorder %s2207_s16, %s1836_s29  ;;  %p2276_p5 = scmp.ne.s32.totalorder %s2268_s22, 0 }
  0x5b   : > { %v280_v17 = vsub.s32 5, %v224_v1  ;;  %v269_v18 = vsub.s32 4, %v224_v1  ;;  %v302_v23 = vsub.s32 7, %v224_v1  ;;  %v291_v24 = vsub.s32 6, %v224_v1  ;;  %s1930_s12 = smov [#allocation7]  }
  0x5c   : > { %v330_v6 = vrot.slane %v218_v4, %v2120_v2  ;;  %v341_v8 = vrot.slane %v218_v4, %v2122_v3  ;;  %v226_v9 = vrot.slane %v219_v7, %v2120_v2  ;;  %v237_v10 = vrot.slane %v219_v7, %v2122_v3  ;;  %p1838_p7 = pnand %p1837_p0, %p2276_p5  ;;  %s1840_s25 = sshll.u32 %s1930_s12, 4  ;;  %s1841_s25 = int_to_ptr.vmem [resolvable:$false] %s1840_s25 }
  0x5d   : > { %v259_v13 = vrot.slane %v219_v7, %v258_v11  ;;  %v248_v14 = vrot.slane %v219_v7, %v247_v12  ;;  %v363_v15 = vrot.slane %v218_v4, %v258_v11  ;;  %v352_v16 = vrot.slane %v218_v4, %v247_v12  ;;  %s1842_s26 = scalar_lea.vmem %s1841_s25, 256  ;;  %p1843_p10 = scmp.lt.s32.totalorder %s2207_s16, %s1841_s25 }
  0x5e   : > { %336 = vbcast.lane.b32.xlu0 %v330_v6, 264  ;;  %332 = vbcast.lane.b32.xlu1 %v330_v6, 256  ;;  %v281_v19 = vrot.slane %v219_v7, %v280_v17  ;;  %v270_v20 = vrot.slane %v219_v7, %v269_v18  ;;  %v385_v21 = vrot.slane %v218_v4, %v280_v17  ;;  %p1839_p4 = pneg %p1838_p7  ;;  %p1844_p12 = scmp.lt.s32.totalorder %s1842_s26, %s1836_s29 }
  0x5f   : > { %v374_v22 = vrot.slane %v218_v4, %v269_v18  ;;  %v303_v25 = vrot.slane %v219_v7, %v302_v23  ;;  %v292_v26 = vrot.slane %v219_v7, %v291_v24  ;;  %v407_v27 = vrot.slane %v218_v4, %v302_v23 }
  0x60   : > { %v396_v28 = vrot.slane %v218_v4, %v291_v24  ;;  %v434_v31 = vrot.slane %v220_v30, %v2120_v2  ;;  %v445_v32 = vrot.slane %v220_v30, %v2122_v3  ;;  %v456_v33 = vrot.slane %v220_v30, %v247_v12  ;;  %p1845_p1 = por %p1844_p12, %p1843_p10 }
  0x61   : > { %v467_v34 = vrot.slane %v220_v30, %v258_v11  ;;  %v478_v35 = vrot.slane %v220_v30, %v269_v18  ;;  %v489_v36 = vrot.slane %v220_v30, %v280_v17  ;;  %v500_v38 = vrot.slane %v220_v30, %v291_v24 }
  0x62   : > { %343 = vbcast.lane.b32.xlu1 %v341_v8, 256  ;;  %228 = vbcast.lane.b32.xlu0 %v226_v9, 256  ;;  %v511_v39 = vrot.slane %v220_v30, %v302_v23  ;;  %p1846_p2 = pnand %p1845_p1, %p1839_p4 }
  0x66   : > { %347 = vbcast.lane.b32.xlu1 %v341_v8, 264  ;;  %239 = vbcast.lane.b32.xlu0 %v237_v10, 256 }
  0x6a   : > { %243 = vbcast.lane.b32.xlu1 %v237_v10, 264  ;;  %232 = vbcast.lane.b32.xlu0 %v226_v9, 264 }
  0x6e   : > { %261 = vbcast.lane.b32.xlu1 %v259_v13, 256  ;;  %250 = vbcast.lane.b32.xlu0 %v248_v14, 256 }
  0x72   : > { %365 = vbcast.lane.b32.xlu1 %v363_v15, 256  ;;  %354 = vbcast.lane.b32.xlu0 %v352_v16, 256 }
  0x76   : > { %265 = vbcast.lane.b32.xlu1 %v259_v13, 264  ;;  %254 = vbcast.lane.b32.xlu0 %v248_v14, 264 }
  0x7a   : > { %369 = vbcast.lane.b32.xlu1 %v363_v15, 264  ;;  %358 = vbcast.lane.b32.xlu0 %v352_v16, 264 }
  0x7e   : > { %283 = vbcast.lane.b32.xlu1 %v281_v19, 256  ;;  %272 = vbcast.lane.b32.xlu0 %v270_v20, 256 }
  0x82   : > { %387 = vbcast.lane.b32.xlu1 %v385_v21, 256  ;;  %376 = vbcast.lane.b32.xlu0 %v374_v22, 256 }
  0x86   : > { %287 = vbcast.lane.b32.xlu1 %v281_v19, 264  ;;  %276 = vbcast.lane.b32.xlu0 %v270_v20, 264 }
  0x8a   : > { %391 = vbcast.lane.b32.xlu1 %v385_v21, 264  ;;  %380 = vbcast.lane.b32.xlu0 %v374_v22, 264 }
  0x8e   : > { %305 = vbcast.lane.b32.xlu1 %v303_v25, 256  ;;  %294 = vbcast.lane.b32.xlu0 %v292_v26, 256 }
  0x92   : > { %409 = vbcast.lane.b32.xlu1 %v407_v27, 256  ;;  %398 = vbcast.lane.b32.xlu0 %v396_v28, 256 }
  0x96   : > { %309 = vbcast.lane.b32.xlu1 %v303_v25, 264  ;;  %298 = vbcast.lane.b32.xlu0 %v292_v26, 264 }
  0x9a   : > { %413 = vbcast.lane.b32.xlu1 %v407_v27, 264  ;;  %402 = vbcast.lane.b32.xlu0 %v396_v28, 264  ;;  %v1929_v27 = vmov 1.0|1.0  }
  0x9e   : > { %440 = vbcast.lane.b32.xlu1 %v434_v31, 264  ;;  %436 = vbcast.lane.b32.xlu0 %v434_v31, 256 }
  0xa2   : > { %451 = vbcast.lane.b32.xlu1 %v445_v32, 264  ;;  %447 = vbcast.lane.b32.xlu0 %v445_v32, 256 }
  0xa6   : > { %462 = vbcast.lane.b32.xlu1 %v456_v33, 264  ;;  %458 = vbcast.lane.b32.xlu0 %v456_v33, 256 }
  0xaa   : > { %473 = vbcast.lane.b32.xlu1 %v467_v34, 264  ;;  %469 = vbcast.lane.b32.xlu0 %v467_v34, 256 }
  0xae   : > { %484 = vbcast.lane.b32.xlu1 %v478_v35, 264  ;;  %480 = vbcast.lane.b32.xlu0 %v478_v35, 256 }
  0xb2   : > { %495 = vbcast.lane.b32.xlu1 %v489_v36, 264  ;;  %491 = vbcast.lane.b32.xlu0 %v489_v36, 256 }
  0xb6   : > { %506 = vbcast.lane.b32.xlu1 %v500_v38, 264  ;;  %502 = vbcast.lane.b32.xlu0 %v500_v38, 256 }
  0xba   : > { %517 = vbcast.lane.b32.xlu1 %v511_v39, 264  ;;  %513 = vbcast.lane.b32.xlu0 %v511_v39, 256 }
  0xd0   : > { %v337_v40 = vpop.permute.xlu0 %336  ;;  %v333_v41 = vpop.permute.xlu1 %332 }
  0xd4   : > { %v344_v43 = vpop.permute.xlu1 %343  ;;  %v229_v44 = vpop.permute.xlu0 %228 }
  0xd5   : > { %vm311_vm1 = vcmp.eq.s32.totalorder %v2137_v42, %v229_v44 }
  0xd6   : > { %v415_v45 = vsel %vm311_vm1, %v333_v41, 0.0 }
  0xd8   : > { %v348_v46 = vpop.permute.xlu1 %347  ;;  %567 = vxpose.xlu0.b32.start [1/2] (short) (narrow) %v415_v45, 8  ;;  %v240_v47 = vpop.permute.xlu0 %239 }
  0xd9   : > { %vm313_vm3 = vcmp.eq.s32.totalorder %v2137_v42, %v240_v47 }
  0xda   : > { %v417_v53 = vsel %vm313_vm3, %v344_v43, 0.0 }
  0xdc   : > { %v244_v48 = vpop.permute.xlu1 %243  ;;  %v233_v49 = vpop.permute.xlu0 %232 }
  0xdd   : > { %vm312_vm2 = vcmp.eq.s32.totalorder %v2137_v42, %v233_v49  ;;  %vm314_vm4 = vcmp.eq.s32.totalorder %v2137_v42, %v244_v48 }
  0xde   : > { %v416_v50 = vsel %vm312_vm2, %v337_v40, 0.0  ;;  %v418_v57 = vsel %vm314_vm4, %v348_v46, 0.0 }
  0xdf   : > { %568 = vxpose.xlu0.b32.end [2/2] (short) (narrow) %v416_v50, 8 }
  0xe0   : > { %v262_v51 = vpop.permute.xlu1 %261  ;;  %v251_v52 = vpop.permute.xlu0 %250 }
  0xe1   : > { %vm315_vm5 = vcmp.eq.s32.totalorder %v2137_v42, %v251_v52  ;;  %vm317_vm7 = vcmp.eq.s32.totalorder %v2137_v42, %v262_v51 }
  0xe3   : > { %673 = vxpose.xlu1.b32.start [1/2] (short) (narrow) %v417_v53, 8 }
  0xe4   : > { %v366_v54 = vpop.permute.xlu1 %365  ;;  %v355_v55 = vpop.permute.xlu0 %354 }
  0xe5   : > { %v419_v56 = vsel %vm315_vm5, %v355_v55, 0.0  ;;  %v421_v1 = vsel %vm317_vm7, %v366_v54, 0.0 }
  0xe6   : > { %778 = vxpose.xlu0.b32.start [1/2] (short) (narrow) %v419_v56, 8 }
  0xe7   : > { %674 = vxpose.xlu1.b32.end [2/2] (short) (narrow) %v418_v57, 8 }
  0xe8   : > { %v266_v58 = vpop.permute.xlu1 %265  ;;  %v255_v59 = vpop.permute.xlu0 %254 }
  0xe9   : > { %vm316_vm6 = vcmp.eq.s32.totalorder %v2137_v42, %v255_v59  ;;  %vm318_vm8 = vcmp.eq.s32.totalorder %v2137_v42, %v266_v58 }
  0xec   : > { %v370_v60 = vpop.permute.xlu1 %369  ;;  %v359_v61 = vpop.permute.xlu0 %358 }
  0xed   : > { %v420_v62 = vsel %vm316_vm6, %v359_v61, 0.0  ;;  %v422_v4 = vsel %vm318_vm8, %v370_v60, 0.0 }
  0xee   : > { %779 = vxpose.xlu0.b32.end [2/2] (short) (narrow) %v420_v62, 8 }
  0xf0   : > { %v284_v63 = vpop.permute.xlu1 %283  ;;  %v273_v0 = vpop.permute.xlu0 %272 }
  0xf1   : > { %vm319_vm9 = vcmp.eq.s32.totalorder %v2137_v42, %v273_v0  ;;  %vm321_vm10 = vcmp.eq.s32.totalorder %v2137_v42, %v284_v63 }
  0xf2   : > { %883 = vxpose.xlu0.b32.start [1/2] (short) (narrow) %v421_v1, 8 }
  0xf4   : > { %v388_v2 = vpop.permute.xlu1 %387  ;;  %v377_v3 = vpop.permute.xlu0 %376 }
  0xf5   : > { %v423_v5 = vsel %vm319_vm9, %v377_v3, 0.0  ;;  %v425_v8 = vsel %vm321_vm10, %v388_v2, 0.0  ;;  %vm599_vm10 = vcmask 130048  }
  0xf6   : > { %884 = vxpose.xlu0.b32.end [2/2] (short) (narrow) %v422_v4, 8  ;;  %988 = vxpose.xlu1.b32.start [1/2] (short) (narrow) %v423_v5, 8 }
  0xf8   : > { %v288_v6 = vpop.permute.xlu1 %287  ;;  %v277_v7 = vpop.permute.xlu0 %276 }
  0xf9   : > { %vm322_vm11 = vcmp.eq.s32.totalorder %v2137_v42, %v288_v6  ;;  %vm320_vm12 = vcmp.eq.s32.totalorder %v2137_v42, %v277_v7 }
  0xfa   : > { %1093 = vxpose.xlu0.b32.start [1/2] (short) (narrow) %v425_v8, 8 }
  0xfc   : > { %v392_v9 = vpop.permute.xlu1 %391  ;;  %v381_v10 = vpop.permute.xlu0 %380 }
  0xfd   : > { %v426_v11 = vsel %vm322_vm11, %v392_v9, 0.0  ;;  %v424_v12 = vsel %vm320_vm12, %v381_v10, 0.0 }
  0xfe   : > { %1094 = vxpose.xlu0.b32.end [2/2] (short) (narrow) %v426_v11, 8  ;;  %989 = vxpose.xlu1.b32.end [2/2] (short) (narrow) %v424_v12, 8 }
 0x100   : > { %v306_v13 = vpop.permute.xlu1 %305  ;;  %v295_v14 = vpop.permute.xlu0 %294 }
 0x101   : > { %vm325_vm13 = vcmp.eq.s32.totalorder %v2137_v42, %v306_v13  ;;  %vm323_vm14 = vcmp.eq.s32.totalorder %v2137_v42, %v295_v14 }
 0x104   : > { %v410_v15 = vpop.permute.xlu1 %409  ;;  %v399_v16 = vpop.permute.xlu0 %398 }
 0x105   : > { %v429_v17 = vsel %vm325_vm13, %v410_v15, 0.0  ;;  %v427_v18 = vsel %vm323_vm14, %v399_v16, 0.0 }
 0x106   : > { %1303 = vxpose.xlu0.b32.start [1/2] (short) (narrow) %v429_v17, 8  ;;  %1198 = vxpose.xlu1.b32.start [1/2] (short) (narrow) %v427_v18, 8 }
 0x108   : > { %v310_v19 = vpop.permute.xlu1 %309  ;;  %v299_v20 = vpop.permute.xlu0 %298 }
 0x109   : > { %vm326_vm15 = vcmp.eq.s32.totalorder %v2137_v42, %v310_v19  ;;  %vm324_vm1 = vcmp.eq.s32.totalorder %v2137_v42, %v299_v20 }
 0x10c   : > { %v414_v21 = vpop.permute.xlu1 %413  ;;  %v403_v22 = vpop.permute.xlu0 %402 }
 0x10d   : > { %v430_v23 = vsel %vm326_vm15, %v414_v21, 0.0  ;;  %v428_v24 = vsel %vm324_vm1, %v403_v22, 0.0 }
 0x10e   : > { %1304 = vxpose.xlu0.b32.end [2/2] (short) (narrow) %v430_v23, 8  ;;  %1199 = vxpose.xlu1.b32.end [2/2] (short) (narrow) %v428_v24, 8 }
 0x110   : > { %v441_v25 = vpop.permute.xlu1 %440  ;;  %v437_v26 = vpop.permute.xlu0 %436 }
 0x111   : > { %vm520_vm2 = vcmp.eq.s32.totalorder %v2137_v42, %v441_v25  ;;  %vm519_vm3 = vcmp.eq.s32.totalorder %v2137_v42, %v437_v26 }
 0x112   : > { %vm1680_vm4 = vmpackc.low %vm520_vm2, %vm519_vm3 }
 0x113   : > { %1681 = vmatpush3.bf16.msk.msra.mxu0 %vm1680_vm4, %v1929_v27 }
 0x114   : > { %v452_v28 = vpop.permute.xlu1 %451  ;;  %v448_v30 = vpop.permute.xlu0 %447  ;;  %1685 = vmatprep.subr.bf16.mxu0 %v1926_v29 }
 0x115   : > { %vm522_vm5 = vcmp.eq.s32.totalorder %v2137_v42, %v452_v28  ;;  %vm521_vm6 = vcmp.eq.s32.totalorder %v2137_v42, %v448_v30 }
 0x116   : > { %vm1683_vm7 = vmpackc.low %vm522_vm5, %vm521_vm6 }
 0x117   : > { %1684 = vmatpush3.bf16.msk.msra.mxu1 %vm1683_vm7, %v1929_v27 }
 0x118   : > { %1688 = vmatprep.subr.bf16.mxu1 %v1926_v29  ;;  %v459_v31 = vpop.permute.xlu0 %458  ;;  %v463_v33 = vpop.permute.xlu1 %462 }
 0x119   : > { %vm524_vm8 = vcmp.eq.s32.totalorder %v2137_v42, %v463_v33  ;;  %vm523_vm9 = vcmp.eq.s32.totalorder %v2137_v42, %v459_v31 }
 0x11a   : > { %vm1686_vm11 = vmpackc.low %vm524_vm8, %vm523_vm9 }
 0x11c   : > { %v470_v32 = vpop.permute.xlu0 %469  ;;  %v474_v35 = vpop.permute.xlu1 %473 }
 0x11d   : > { %vm526_vm12 = vcmp.eq.s32.totalorder %v2137_v42, %v474_v35  ;;  %vm525_vm13 = vcmp.eq.s32.totalorder %v2137_v42, %v470_v32 }
 0x11e   : > { %vm1689_vm14 = vmpackc.low %vm526_vm12, %vm525_vm13 }
 0x120   : > { %v481_v34 = vpop.permute.xlu0 %480  ;;  %v485_v38 = vpop.permute.xlu1 %484 }
 0x121   : > { %vm528_vm15 = vcmp.eq.s32.totalorder %v2137_v42, %v485_v38  ;;  %vm527_vm1 = vcmp.eq.s32.totalorder %v2137_v42, %v481_v34 }
 0x122   : > { %vm1692_vm2 = vmpackc.low %vm528_vm15, %vm527_vm1 }
 0x124   : > { %v492_v36 = vpop.permute.xlu0 %491  ;;  %v496_v40 = vpop.permute.xlu1 %495 }
 0x125   : > { %vm530_vm3 = vcmp.eq.s32.totalorder %v2137_v42, %v496_v40  ;;  %vm529_vm4 = vcmp.eq.s32.totalorder %v2137_v42, %v492_v36 }
 0x126   : > { %vm1695_vm5 = vmpackc.low %vm530_vm3, %vm529_vm4 }
 0x128   : > { %v503_v39 = vpop.permute.xlu0 %502  ;;  %v507_v43 = vpop.permute.xlu1 %506 }
 0x129   : > { %vm532_vm6 = vcmp.eq.s32.totalorder %v2137_v42, %v507_v43  ;;  %vm531_vm7 = vcmp.eq.s32.totalorder %v2137_v42, %v503_v39 }
 0x12c   : > { %v514_v41 = vpop.permute.xlu0 %513  ;;  %v518_v45 = vpop.permute.xlu1 %517 }
 0x12d   : > { %vm534_vm8 = vcmp.eq.s32.totalorder %v2137_v42, %v518_v45  ;;  %vm533_vm9 = vcmp.eq.s32.totalorder %v2137_v42, %v514_v41 }
 0x12e   : > { %vm1701_vm12 = vmpackc.low %vm534_vm8, %vm533_vm9 }
 0x15b   : > { %v583_v44 = vpop.trf.xlu0 }
 0x15c   : > { %1628 = vmatmul.mubr.msk.f32.vlgmr.msra.gmra.mrb[0].mxu0 %vm599_vm10, %v583_v44 }
 0x15d   : > { %1687 = vmatpush3.bf16.msk.msra.mxu0 %vm1686_vm11, %v1929_v27  ;;  %1641 = vmatprep.mubr.msk.f32.mxu0 %vm1927_vm0, %v1928_v37  ;;  %vm1698_vm11 = vmpackc.low %vm532_vm6, %vm531_vm7 }
 0x15e   : > { %1691 = vmatprep.subr.bf16.mxu0 %v1926_v29 }
 0x163   : > { %v689_v46 = vpop.trf.xlu1 }
 0x164   : > { %1635 = vmatmul.mubr.msk.f32.vlgmr.msra.gmra.mrb[0].mxu1 %vm599_vm10, %v689_v46 }
 0x165   : > { %1690 = vmatpush3.bf16.msk.msra.mxu1 %vm1689_vm14, %v1929_v27  ;;  %1648 = vmatprep.mubr.msk.f32.mxu1 %vm1927_vm0, %v1928_v37 }
 0x166   : > { %1694 = vmatprep.subr.bf16.mxu1 %v1926_v29 }
 0x16a   : > { %v794_v47 = vpop.trf.xlu0 }
 0x16b   : > { %1642 = vmatmul.mubr.msk.f32.vlgmr.msra.gmra.mrb[2].mxu0 %vm599_vm10, %v794_v47 }
 0x16c   : > { %1693 = vmatpush3.bf16.msk.msra.mxu0 %vm1692_vm2, %v1929_v27  ;;  %1655 = vmatprep.mubr.msk.f32.mxu0 %vm1927_vm0, %v1928_v37 }
 0x16d   : > { %1697 = vmatprep.subr.bf16.mxu0 %v1926_v29 }
 0x172   : > { %v899_v48 = vpop.trf.xlu0 }
 0x173   : > { %1649 = vmatmul.mubr.msk.f32.vlgmr.msra.gmra.mrb[2].mxu1 %vm599_vm10, %v899_v48 }
 0x174   : > { %1696 = vmatpush3.bf16.msk.msra.mxu1 %vm1695_vm5, %v1929_v27  ;;  %1662 = vmatprep.mubr.msk.f32.mxu1 %vm1927_vm0, %v1928_v37 }
 0x175   : > { %1700 = vmatprep.subr.bf16.mxu1 %v1926_v29 }
 0x17a   : > { %v1004_v49 = vpop.trf.xlu1  ;;  %v1109_v50 = vpop.trf.xlu0 }
 0x17b   : > { %1656 = vmatmul.mubr.msk.f32.vlgmr.msra.gmra.mrb[4].mxu0 %vm599_vm10, %v1004_v49  ;;  %1663 = vmatmul.mubr.msk.f32.vlgmr.msra.gmra.mrb[4].mxu1 %vm599_vm10, %v1109_v50 }
 0x17c   : > { %1699 = vmatpush3.bf16.msk.msra.mxu0 %vm1698_vm11, %v1929_v27  ;;  %1702 = vmatpush3.bf16.msk.msra.mxu1 %vm1701_vm12, %v1929_v27 }
 0x17d   : > { %1669 = vmatprep.mubr.msk.f32.mxu0 %vm1927_vm0, %v1928_v37  ;;  %1676 = vmatprep.mubr.msk.f32.mxu1 %vm1927_vm0, %v1928_v37 }
 0x18a   : > { %v1214_v29 = vpop.trf.xlu1  ;;  %v1319_v42 = vpop.trf.xlu0 }
 0x18b   : > { %1670 = vmatmul.mubr.msk.f32.vlgmr.msra.gmra.mrb[6].mxu0 %vm599_vm10, %v1214_v29  ;;  %1677 = vmatmul.mubr.msk.f32.vlgmr.msra.gmra.mrb[6].mxu1 %vm599_vm10, %v1319_v42 }
 0x22f   : > { %v669_v51 = vpop.f32.mrb[0].mxu0 }
 0x230   : > { %1408 = vst [vmem:[%s215_s21] sm:$0x1] %v669_v51  ;;  %v1629_v52 = vpop.f32.mrb[1].mxu0 }
 0x237   : > { %v774_v53 = vpop.f32.mrb[0].mxu1 }
 0x238   : > { %1409 = vst [vmem:[%s215_s21 + $0x1] sm:$0x1] %v774_v53  ;;  %v1636_v54 = vpop.f32.mrb[1].mxu1 }
 0x23e   : > { %v879_v55 = vpop.f32.mrb[2].mxu0 }
 0x23f   : > { %1410 = vst [vmem:[%s215_s21 + $0x2] sm:$0x1] %v879_v55  ;;  %v1643_v56 = vpop.f32.mrb[3].mxu0 }
 0x246   : > { %v984_v57 = vpop.f32.mrb[2].mxu1 }
 0x247   : > { %1411 = vst [vmem:[%s215_s21 + $0x3] sm:$0x1] %v984_v57  ;;  %v1650_v37 = vpop.f32.mrb[3].mxu1 }
 0x24e   : > { %v1089_v58 = vpop.f32.mrb[4].mxu0  ;;  %v1194_v59 = vpop.f32.mrb[4].mxu1 }
 0x24f   : > { %1412 = vst [vmem:[%s215_s21 + $0x4] sm:$0x1] %v1089_v58  ;;  %1413 = vst [vmem:[%s215_s21 + $0x5] sm:$0x1] %v1194_v59  ;;  %v1657_v60 = vpop.f32.mrb[5].mxu0  ;;  %v1664_v61 = vpop.f32.mrb[5].mxu1 }
 0x25e   : > { %v1299_v62 = vpop.f32.mrb[6].mxu0  ;;  %v1404_v63 = vpop.f32.mrb[6].mxu1 }
 0x25f   : > { %1414 = vst [vmem:[%s215_s21 + $0x6] sm:$0x1] %v1299_v62  ;;  %1415 = vst [vmem:[%s215_s21 + $0x7] sm:$0x1] %v1404_v63  ;;  %v1671_v0 = vpop.f32.mrb[7].mxu0  ;;  %v1678_v1 = vpop.f32.mrb[7].mxu1 }
 0x260   : > { %1849 = shalt.err (!%p1846_p2)
}
 0x261   : > { %s1850_s3 = scalar_lea.hbm %s2212_s27, 128  ;;  %s1854_s4 = scalar_lea.hbm %s2263_s2, 256 }
 0x262   : > { %p1851_p9 = scmp.ne.s32.totalorder %s2212_s27, %s1850_s3  ;;  %p1855_p6 = scmp.lt.u32.totalorder %s2212_s27, %s2263_s2 }
 0x263   : > { %p1856_p13 = scmp.lt.u32.totalorder %s1854_s4, %s1850_s3  ;;  %p1858_p0 = scmp.lt.u32.totalorder %s1850_s3, %s2212_s27 }
 0x264   : > { %p1852_p11 = pnand %p1851_p9, %p2276_p5 }
 0x265   : > { %p1857_p8 = por %p1856_p13, %p1855_p6 }
 0x266   : > { %p1853_p3 = pneg %p1852_p11 }
 0x267   : > { %p1859_p7 = por %p1858_p0, %p1857_p8 }
 0x269   : > { %p1860_p4 = pnand %p1859_p7, %p1853_p3 }
 0x26b   : > { %1863 = shalt.err (!%p1860_p4)
}
 0x26c   : > { %s1931_s7 = smov 16   ;;  %s1932_s21 = smov 1  }
 0x26d   : > { %1707 = dma.vmem_to_hbm [thread:$0]  (%p2276_p5), %s2207_s16, 128, %s2212_s27, %s1417_s28, %s1931_s7, %s1931_s7, %s1932_s21  }
 0x26e PF: > { %s1447_s19 = sand.u32 1, %s1902_s9   ;;  %p2277_p10 = scmp.ne.s32.totalorder %s2269_s24, 0 }
 0x26f   : > { %p2278_p12 = scmp.ge.s32.totalorder %s1922_s14, 2  ;;  %s1448_s30 = scalar_lea.sflag [#allocation4], %s1447_s19 }
 0x271   : > { %p1717_p1 = pnand %p2278_p12, %p2277_p10 }
 0x273   : > { %1897 = dma.done.wait (!%p1717_p1), %s1448_s30, 128  }
 0x274   : > { %1899 = vsyncadd (!%p1717_p1), %s1448_s30, 4294967168  ;;  %s21_s14 = sadd.s32 1, %s1922_s14   ;;  %s2279_s9 = smov %s1906_s10 }
 0x275   : > { %p18_p2 = scmp.ge.s32.totalorder %s21_s14, 4   ;;  %s2280_s10 = smov %s1910_s11 }
 0x276   : > { %s2281_s11 = smov %s2004_s23  ;;  %s2282_s12 = smov %s1918_s13 }
 0x277   : > { %s2283_s13 = smov %s2285_s17  ;;  %20 = sbr.rel (!%p18_p2) target bundleno = 8 (0x8), region = 86 }
 0x27e   :  { %1453 = vsyncpa [#allocation3], 1 }
 0x27f   :  { %1455 = vsyncpa [#allocation3 + $0x1], 1 }
 0x280   :  { %1456 = vsyncpa [#allocation6], 1 }
 0x281   :  { %1458 = vsyncpa [#allocation6 + $0x1], 1 }
 0x282   :  { %1459 = vsyncpa [#allocation4], 1 }
 0x283   :  { %1461 = vsyncpa [#allocation4 + $0x1], 1 }

</bundles_post_ra>
